<compile_context>
chip_gen: v6e
topology: v6e:2x2x1
jax: 0.10.0
libtpu: 0.0.40
codegen_flags: <defaults>
</compile_context>

<pallas_src>
import functools

import jax
import jax.numpy as jnp
from jax.experimental import pallas as pl
from jax.experimental.pallas import tpu as pltpu

BN_EPS = 1e-5


def _accum(acc_ref, x, width):
    """Add `width` lanes of x (b_tile, C, width) into the lane-resident
    accumulator (b_tile, C, min(128, width)).  Pure VPU adds; no cross-lane
    reduction in the streaming loop.  `width` is a multiple of 128 whenever it
    exceeds 128 (guaranteed by the host-side tile selection)."""
    if width <= 128:
        acc_ref[...] += x
    else:
        part = x[:, :, 0:128]
        for i in range(1, width // 128):
            part = part + x[:, :, i * 128:(i + 1) * 128]
        acc_ref[...] += part


def aux_head_kernel(x_ref, w1_ref, b1_ref, a_ref, w2_ref, b2_ref, o_ref,
                    acc_ref, *, hw_tile, tail_valid, needs_tail):
    """Grid = (batch_blocks [parallel], spatial_blocks [arbitrary])."""
    s = pl.program_id(1)
    last = pl.num_programs(1) - 1

    # ---- init the lane-resident pooled-sum accumulator ----
    @pl.when(s == 0)
    def _():
        acc_ref[...] = jnp.zeros_like(acc_ref)

    x = x_ref[...]                                          # (Bt, C, HWt)

    # ---- hot path: unmasked full-tile accumulation ----
    if needs_tail:
        @pl.when(s != last)
        def _():
            _accum(acc_ref, x, hw_tile)
    else:
        _accum(acc_ref, x, hw_tile)

    # ---- last step: (masked) tail accumulation + FC epilogue ----
    @pl.when(s == last)
    def _():
        if needs_tail:
            # Lane-only iota; tail_valid is a compile-time constant.
            lane = jax.lax.broadcasted_iota(jnp.int32, (1, 1, hw_tile), 2)
            _accum(acc_ref, jnp.where(lane < tail_valid, x, 0.0), hw_tile)
        # Single cross-lane reduce (XLU) once per batch block.
        pooled = jnp.sum(acc_ref[...], axis=-1)             # (Bt, C)
        # Linear(C -> HID)  (w1 pre-scaled by 1/HW on host)
        h = jnp.dot(pooled, w1_ref[...],
                    preferred_element_type=jnp.float32) + b1_ref[...]
        # PReLU (single shared parameter, PyTorch default num_parameters=1)
        a = a_ref[0, 0]
        h = jnp.where(h > 0.0, h, a * h)
        # BatchNorm1d folded into w2/b2 on host; Linear(HID -> NC_pad)
        o_ref[...] = jnp.dot(h, w2_ref[...],
                             preferred_element_type=jnp.float32) + b2_ref[...]


def _round_down(v, m):
    return (v // m) * m


def _vmem_capacity_bytes():
    try:
        info = pltpu.get_tpu_info()
        for attr in ("vmem_capacity_bytes", "vmem_size_bytes", "vmem_bytes"):
            v = getattr(info, attr, None)
            if v:
                return int(v)
    except Exception:
        pass
    return 64 * 1024 * 1024  # conservative (v7x-class)


def aux_head(x_nchw, params, *, hw_tile=None):
    """x_nchw: (B, C, H, W) float32. Returns (B, num_classes) float32."""
    B, C, H, W = x_nchw.shape
    HW = H * W
    x = x_nchw.reshape(B, C, HW)

    HID = params["w1"].shape[1]
    NC = params["w2"].shape[1]
    NC_pad = max(128, ((NC + 127) // 128) * 128)   # lane-dense output

    # ---- host-side folds (exact, eval mode) ----
    w1_eff = params["w1"] * (1.0 / HW)
    scale = params["gamma"] * jax.lax.rsqrt(params["run_var"] + BN_EPS)  # (1, HID)
    w2p = jnp.pad(params["w2"], ((0, 0), (0, NC_pad - NC)))              # (HID, NC_pad)
    b2p = jnp.pad(params["b2"], ((0, 0), (0, NC_pad - NC)))              # (1, NC_pad)
    w2_eff = scale.reshape(HID, 1) * w2p
    b2_eff = (params["beta"] - params["run_mean"] * scale) @ w2p + b2p

    # ---- generation-aware VMEM budget ----
    vmem_cap = _vmem_capacity_bytes()
    if vmem_cap >= 100 * 1024 * 1024:        # v5e / v6e: 128 MiB physical VMEM
        vmem_limit = 80 * 1024 * 1024
    else:                                     # v7x-class: 64 MiB physical VMEM
        vmem_limit = 44 * 1024 * 1024
    usable = int(vmem_limit * 0.7)            # headroom for params/out/pipeline

    # ---- batch tile: multiple of 8, never degrade to 1, >=2 blocks when B permits ----
    b_tile = min(B, 128)
    if b_tile >= 8:
        b_tile = _round_down(b_tile, 8)
    if B >= 16:
        # keep at least 2 batch blocks so both v7x TensorCores get work
        half = ((pl.cdiv(B, 2) + 7) // 8) * 8
        b_tile = min(b_tile, half)

    # ---- spatial tile: multiple of 128 (or full HW when HW <= 128) ----
    def tile_bytes(bt, ht):
        # double-buffered x stream + lane-resident accumulator
        return 4 * bt * C * (2 * ht + min(128, ht))

    if HW <= 128:
        hw_tile = HW                          # full extent, single step
    else:
        hw_max = _round_down(HW, 128)         # ragged tail handled in-kernel
        hw_tile = hw_max if hw_tile is None else min(
            max(128, _round_down(int(hw_tile), 128)), hw_max)
        # shrink hw_tile (128-lane steps) before touching b_tile
        cap = (usable // (4 * b_tile * C) - 128) // 2
        cap = max(128, _round_down(cap, 128))
        hw_tile = min(hw_tile, cap)
    while b_tile > 8 and tile_bytes(b_tile, hw_tile) > usable:
        b_tile = max(8, _round_down(b_tile // 2, 8))

    nb = pl.cdiv(B, b_tile)
    ns = pl.cdiv(HW, hw_tile)
    needs_tail = (HW % hw_tile) != 0
    tail_valid = HW - (ns - 1) * hw_tile
    acc_w = min(128, hw_tile)

    kernel = functools.partial(
        aux_head_kernel, hw_tile=hw_tile, tail_valid=tail_valid,
        needs_tail=needs_tail)

    grid_spec = pltpu.PrefetchScalarGridSpec(
        num_scalar_prefetch=0,
        grid=(nb, ns),
        in_specs=[
            # streamed activations
            pl.BlockSpec((b_tile, C, hw_tile), lambda b, s: (b, 0, s)),
            # hoisted parameters: constant block index => DMA'd once, resident
            pl.BlockSpec((C, HID), lambda b, s: (0, 0)),
            pl.BlockSpec((1, HID), lambda b, s: (0, 0)),
            pl.BlockSpec((1, 1), lambda b, s: (0, 0),
                         memory_space=pltpu.MemorySpace.SMEM),   # PReLU scalar
            pl.BlockSpec((HID, NC_pad), lambda b, s: (0, 0)),
            pl.BlockSpec((1, NC_pad), lambda b, s: (0, 0)),
        ],
        out_specs=pl.BlockSpec((b_tile, NC_pad), lambda b, s: (b, 0)),
        scratch_shapes=[pltpu.VMEM((b_tile, C, acc_w), jnp.float32)],
    )

    cost = pl.CostEstimate(
        flops=B * C * HW + 2 * B * (C * HID + HID * NC_pad),
        transcendentals=0,
        bytes_accessed=4 * (B * C * HW + C * HID + HID + HID * NC_pad
                            + NC_pad + B * NC_pad),
    )

    out = pl.pallas_call(
        kernel,
        out_shape=jax.ShapeDtypeStruct((B, NC_pad), jnp.float32),
        grid_spec=grid_spec,
        compiler_params=pltpu.CompilerParams(
            dimension_semantics=("parallel", "arbitrary"),
            vmem_limit_bytes=vmem_limit),
        cost_estimate=cost,
    )(x, w1_eff, params["b1"], params["prelu_a"], w2_eff, b2_eff)

    return out[:, :NC]


def make_params(key, base_size, last_fc, num_classes):
    c_in = base_size * 8
    hid = base_size * last_fc
    k1, k2, k3, k4, k5, k6, k7, k8 = jax.random.split(key, 8)
    return {
        "w1": jax.random.normal(k1, (c_in, hid), jnp.float32) * 0.1,
        "b1": jax.random.normal(k2, (1, hid), jnp.float32) * 0.1,
        "prelu_a": jnp.full((1, 1), 0.25, jnp.float32),          # PyTorch default
        "gamma": 1.0 + 0.1 * jax.random.normal(k3, (1, hid), jnp.float32),
        "beta": 0.1 * jax.random.normal(k4, (1, hid), jnp.float32),
        "run_mean": 0.05 * jax.random.normal(k5, (1, hid), jnp.float32),
        "run_var": jnp.abs(1.0 + 0.1 * jax.random.normal(k6, (1, hid), jnp.float32)),
        "w2": jax.random.normal(k7, (hid, num_classes), jnp.float32) * 0.1,
        "b2": jax.random.normal(k8, (1, num_classes), jnp.float32) * 0.1,
    }


def aux_head_ref(x_nchw, p):
    """Pure-JAX reference mirroring the PyTorch eval-mode forward."""
    pooled = jnp.mean(x_nchw, axis=(2, 3))                       # (B, C)
    h = pooled @ p["w1"] + p["b1"]
    h = jnp.where(h > 0, h, p["prelu_a"][0, 0] * h)
    h = (h - p["run_mean"]) * (p["gamma"] / jnp.sqrt(p["run_var"] + BN_EPS)) + p["beta"]
    return h @ p["w2"] + p["b2"]


if __name__ == "__main__":
    base_size, last_fc, num_classes = 4, 2, 10   # C_in = 32, hidden = 8
    B = 2
    C = base_size * 8

    key = jax.random.PRNGKey(0)
    kx1, kx2, kx3, kp = jax.random.split(key, 4)
    params = make_params(kp, base_size, last_fc, num_classes)

    # Case 1: 16x16 spatial, forced 128-wide HW tiles -> multi-step accumulator
    # + pl.when epilogue path, no ragged tail.
    x1 = jax.random.normal(kx1, (B, C, 16, 16), jnp.float32)
    out1 = jax.block_until_ready(aux_head(x1, params, hw_tile=128))
    ref1 = aux_head_ref(x1, params)
    assert out1.shape == (B, num_classes)
    assert jnp.allclose(out1, ref1, atol=1e-4, rtol=1e-4), "mismatch vs reference (case 1)"

    # Case 2: 16x17 spatial (HW=272) with 128-wide tiles -> ragged tail handled
    # by the statically-masked last step only.
    x2 = jax.random.normal(kx2, (B, C, 16, 17), jnp.float32)
    out2 = jax.block_until_ready(aux_head(x2, params, hw_tile=128))
    ref2 = aux_head_ref(x2, params)
    assert jnp.allclose(out2, ref2, atol=1e-4, rtol=1e-4), "mismatch vs reference (case 2)"

    # Case 3: 8x8 spatial (HW=64 < 128) -> full-extent single-step path with a
    # narrow lane-resident accumulator.
    x3 = jax.random.normal(kx3, (B, C, 8, 8), jnp.float32)
    out3 = jax.block_until_ready(aux_head(x3, params))
    ref3 = aux_head_ref(x3, params)
    assert jnp.allclose(out3, ref3, atol=1e-4, rtol=1e-4), "mismatch vs reference (case 3)"

    print("KERNEL_OK")
</pallas_src>

<mosaic_0001>
module attributes {stable_mosaic.version = 11 : i64} {
  func.func @aux_head_kernel(%arg0: i32, %arg1: i32, %arg2: memref<2x32x128xf32, #tpu.memory_space<vmem>>, %arg3: memref<32x8xf32, #tpu.memory_space<vmem>>, %arg4: memref<1x8xf32, #tpu.memory_space<vmem>>, %arg5: memref<1x1xf32, #tpu.memory_space<smem>>, %arg6: memref<8x128xf32, #tpu.memory_space<vmem>>, %arg7: memref<1x128xf32, #tpu.memory_space<vmem>>, %arg8: memref<2x128xf32, #tpu.memory_space<vmem>>, %arg9: memref<2x32x128xf32, #tpu.memory_space<vmem>>) attributes {dimension_semantics = [#tpu.dimension_semantics<parallel>, #tpu.dimension_semantics<arbitrary>], iteration_bounds = array<i64: 1, 2>, scalar_prefetch = 0 : i64, scratch_operands = 1 : i64, tpu.core_type = #tpu.core_type<tc>, window_params = [{transform_indices = @transform_0, window_bounds = array<i64: 2, 32, 128>}, {pipeline_mode = #tpu.pipeline_mode<synchronous>, transform_indices = @transform_1, window_bounds = array<i64: 32, 8>}, {pipeline_mode = #tpu.pipeline_mode<synchronous>, transform_indices = @transform_2, window_bounds = array<i64: 1, 8>}, {transform_indices = @transform_3, window_bounds = array<i64: 1, 1>}, {pipeline_mode = #tpu.pipeline_mode<synchronous>, transform_indices = @transform_4, window_bounds = array<i64: 8, 128>}, {pipeline_mode = #tpu.pipeline_mode<synchronous>, transform_indices = @transform_5, window_bounds = array<i64: 1, 128>}, {transform_indices = @transform_6, window_bounds = array<i64: 2, 128>}]} {
    %c0_i32 = arith.constant 0 : i32
    %0 = arith.cmpi eq, %arg1, %c0_i32 : i32
    %1 = arith.extui %0 : i1 to i32
    %c0_i32_0 = arith.constant 0 : i32
    %2 = arith.cmpi ne, %1, %c0_i32_0 : i32
    scf.if %2 {
      %cst = arith.constant 0.000000e+00 : f32
      %10 = vector.broadcast %cst : f32 to vector<2x32x128xf32>
      %c0_10 = arith.constant 0 : index
      %c0_11 = arith.constant 0 : index
      %c0_12 = arith.constant 0 : index
      %11 = vector.load %arg9[%c0_10, %c0_11, %c0_12] : memref<2x32x128xf32, #tpu.memory_space<vmem>>, vector<2x32x128xf32>
      tpu.vector_store %arg9[%c0_10, %c0_11, %c0_12], %10 {strides = array<i32>} : memref<2x32x128xf32, #tpu.memory_space<vmem>>, vector<2x32x128xf32>,
    } else {
    }
    %c0 = arith.constant 0 : index
    %c0_1 = arith.constant 0 : index
    %c0_2 = arith.constant 0 : index
    %3 = vector.load %arg2[%c0, %c0_1, %c0_2] : memref<2x32x128xf32, #tpu.memory_space<vmem>>, vector<2x32x128xf32>
    %c0_3 = arith.constant 0 : index
    %c0_4 = arith.constant 0 : index
    %c0_5 = arith.constant 0 : index
    %4 = vector.load %arg9[%c0_3, %c0_4, %c0_5] : memref<2x32x128xf32, #tpu.memory_space<vmem>>, vector<2x32x128xf32>
    %5 = arith.addf %4, %3 : vector<2x32x128xf32>
    %c0_6 = arith.constant 0 : index
    %c0_7 = arith.constant 0 : index
    %c0_8 = arith.constant 0 : index
    %6 = vector.load %arg9[%c0_6, %c0_7, %c0_8] : memref<2x32x128xf32, #tpu.memory_space<vmem>>, vector<2x32x128xf32>
    tpu.vector_store %arg9[%c0_6, %c0_7, %c0_8], %5 {strides = array<i32>} : memref<2x32x128xf32, #tpu.memory_space<vmem>>, vector<2x32x128xf32>,
    %c1_i32 = arith.constant 1 : i32
    %7 = arith.cmpi eq, %arg1, %c1_i32 : i32
    %8 = arith.extui %7 : i1 to i32
    %c0_i32_9 = arith.constant 0 : i32
    %9 = arith.cmpi ne, %8, %c0_i32_9 : i32
    scf.if %9 {
      %c0_10 = arith.constant 0 : index
      %c0_11 = arith.constant 0 : index
      %c0_12 = arith.constant 0 : index
      %10 = vector.load %arg9[%c0_10, %c0_11, %c0_12] : memref<2x32x128xf32, #tpu.memory_space<vmem>>, vector<2x32x128xf32>
      %cst = arith.constant dense<0.000000e+00> : vector<2x32xf32>
      %11 = vector.multi_reduction <add>, %10, %cst [2] : vector<2x32x128xf32> to vector<2x32xf32>
      %c0_13 = arith.constant 0 : index
      %c0_14 = arith.constant 0 : index
      %12 = vector.load %arg3[%c0_13, %c0_14] : memref<32x8xf32, #tpu.memory_space<vmem>>, vector<32x8xf32>
      %cst_15 = arith.constant dense<0.000000e+00> : vector<2x8xf32>
      %13 = tpu.matmul %11, %12, %cst_15 {dimension_numbers = #tpu.dot_dimension_numbers<[1], [0], [0], [1], [0, 0, 1, 1], [], []>} : vector<2x32xf32>, vector<32x8xf32>, vector<2x8xf32> -> vector<2x8xf32>
      %c0_16 = arith.constant 0 : index
      %c0_17 = arith.constant 0 : index
      %14 = vector.load %arg4[%c0_16, %c0_17] : memref<1x8xf32, #tpu.memory_space<vmem>>, vector<1x8xf32>
      %15 = vector.broadcast %14 : vector<1x8xf32> to vector<2x8xf32>
      %16 = arith.addf %13, %15 : vector<2x8xf32>
      %c0_18 = arith.constant 0 : index
      %c0_19 = arith.constant 0 : index
      %17 = memref.load %arg5[%c0_18, %c0_19] : memref<1x1xf32, #tpu.memory_space<smem>>
      %cst_20 = arith.constant 0.000000e+00 : f32
      %18 = vector.broadcast %cst_20 : f32 to vector<2x8xf32>
      %19 = arith.cmpf ogt, %16, %18 : vector<2x8xf32>
      %20 = vector.broadcast %17 : f32 to vector<2x8xf32>
      %21 = arith.mulf %20, %16 : vector<2x8xf32>
      %22 = arith.select %19, %16, %21 : vector<2x8xi1>, vector<2x8xf32>
      %c0_21 = arith.constant 0 : index
      %c0_22 = arith.constant 0 : index
      %23 = vector.load %arg6[%c0_21, %c0_22] : memref<8x128xf32, #tpu.memory_space<vmem>>, vector<8x128xf32>
      %cst_23 = arith.constant dense<0.000000e+00> : vector<2x128xf32>
      %24 = tpu.matmul %22, %23, %cst_23 {dimension_numbers = #tpu.dot_dimension_numbers<[1], [0], [0], [1], [0, 0, 1, 1], [], []>} : vector<2x8xf32>, vector<8x128xf32>, vector<2x128xf32> -> vector<2x128xf32>
      %c0_24 = arith.constant 0 : index
      %c0_25 = arith.constant 0 : index
      %25 = vector.load %arg7[%c0_24, %c0_25] : memref<1x128xf32, #tpu.memory_space<vmem>>, vector<1x128xf32>
      %26 = vector.broadcast %25 : vector<1x128xf32> to vector<2x128xf32>
      %27 = arith.addf %24, %26 : vector<2x128xf32>
      %c0_26 = arith.constant 0 : index
      %c0_27 = arith.constant 0 : index
      %28 = vector.load %arg8[%c0_26, %c0_27] : memref<2x128xf32, #tpu.memory_space<vmem>>, vector<2x128xf32>
      tpu.vector_store %arg8[%c0_26, %c0_27], %27 {strides = array<i32>} : memref<2x128xf32, #tpu.memory_space<vmem>>, vector<2x128xf32>,
    } else {
    }
    return
  }
  func.func @transform_0(%arg0: i32, %arg1: i32) -> (i32, i32, i32) {
    %c0_i32 = arith.constant 0 : i32
    %c0_i32_0 = arith.constant 0 : i32
    return %arg0, %c0_i32, %arg1 : i32, i32, i32
  }
  func.func @transform_1(%arg0: i32, %arg1: i32) -> (i32, i32) {
    %c0_i32 = arith.constant 0 : i32
    %c0_i32_0 = arith.constant 0 : i32
    %c0_i32_1 = arith.constant 0 : i32
    return %c0_i32, %c0_i32_0 : i32, i32
  }
  func.func @transform_2(%arg0: i32, %arg1: i32) -> (i32, i32) {
    %c0_i32 = arith.constant 0 : i32
    %c0_i32_0 = arith.constant 0 : i32
    %c0_i32_1 = arith.constant 0 : i32
    return %c0_i32, %c0_i32_0 : i32, i32
  }
  func.func @transform_3(%arg0: i32, %arg1: i32) -> (i32, i32) {
    %c0_i32 = arith.constant 0 : i32
    %c0_i32_0 = arith.constant 0 : i32
    %c0_i32_1 = arith.constant 0 : i32
    return %c0_i32, %c0_i32_0 : i32, i32
  }
  func.func @transform_4(%arg0: i32, %arg1: i32) -> (i32, i32) {
    %c0_i32 = arith.constant 0 : i32
    %c0_i32_0 = arith.constant 0 : i32
    %c0_i32_1 = arith.constant 0 : i32
    return %c0_i32, %c0_i32_0 : i32, i32
  }
  func.func @transform_5(%arg0: i32, %arg1: i32) -> (i32, i32) {
    %c0_i32 = arith.constant 0 : i32
    %c0_i32_0 = arith.constant 0 : i32
    %c0_i32_1 = arith.constant 0 : i32
    return %c0_i32, %c0_i32_0 : i32, i32
  }
  func.func @transform_6(%arg0: i32, %arg1: i32) -> (i32, i32) {
    %c0_i32 = arith.constant 0 : i32
    %c0_i32_0 = arith.constant 0 : i32
    return %arg0, %c0_i32 : i32, i32
  }
}

</mosaic_0001>

<bundles_post_ra>
// kernel: tpu_custom_call.1
= control target key start
LH: loop header
LB: loop body
LE: loop exit
PB: predicated region body
PF: predicated region fallthrough
CT: control target
= control target key end

     0   :  { %s1060_s0 = inlined_call_operand.hbm [shape: f32[2,32,256], index: 0, kind: input, shape index: {}]   ;;  %s1061_s1 = inlined_call_operand.vmem [shape: f32[32,8], index: 1, kind: input, shape index: {}]   ;;  %s1062_s2 = inlined_call_operand.vmem [shape: f32[1,8], index: 2, kind: input, shape index: {}]   ;;  %s1063_s3 = inlined_call_operand.<no memory space> [shape: f32[1,1], index: 3, kind: input, shape index: {}]   ;;  %s1064_s4 = inlined_call_operand.vmem [shape: f32[8,128], index: 4, kind: input, shape index: {}]   ;;  %s1065_s5 = inlined_call_operand.vmem [shape: f32[1,128], index: 5, kind: input, shape index: {}]   ;;  %s1066_s6 = inlined_call_operand.hbm [shape: f32[2,128], index: 6, kind: output, shape index: {}]  }
   0x1   :  { %11 = sst [smem:[#allocation3]] %s1063_s3 }
   0x2   :  { %12 = vsyncpa [#allocation5], 0 }
   0x3   :  { %14 = vsyncpa [#allocation5 + $0x1], 0 }
   0x4   :  { %15 = vsyncpa [#allocation6], 0  ;;  %s915_s23 = smov 0   ;;  %s917_s24 = smov 0  }
   0x5   :  { %s919_s25 = smov 0   ;;  %s921_s26 = smov 0  }
   0x6   :  { %s923_s27 = smov 0   ;;  %s925_s28 = smov 0  }
   0x7 LB: > { %s653_s3 = sadd.s32 4294967295, %s867_s28   ;;  %s30_s29 = sadd.s32 1, %s863_s27  ;;  %s867_s28 = sphi %s925_s28, %s21_s28   ;;  %s863_s27 = sphi %s923_s27, %s1075_s27   ;;  %s859_s26 = sphi %s921_s26, %s1074_s26   ;;  %s855_s25 = sphi %s919_s25, %s1073_s25   ;;  %s851_s24 = sphi %s917_s24, %s1072_s24   ;;  %s847_s23 = sphi %s915_s23, %s1071_s23  }
   0x8   : > { %p31_p0 = scmp.ge.s32.totalorder %s30_s29, 2  ;;  %s42_s30 = sadd.s32 1, %s855_s25 }
   0x9   : > { %p49_p1 = scmp.ne.s32.totalorder %s855_s25, %s851_s24  ;;  %p50_p2 = scmp.eq.s32.totalorder %s867_s28, 0 }
   0xa   : > { %s1077_s29 = smov (%p31_p0, %s30_s29), 0  ;;  %p55_p4 = scmp.ne.s32.totalorder %s851_s24, %s847_s23 }
   0xb   : > { %p951_p3 = por %p50_p2, %p49_p1  ;;  %s38_s8 = ssub.s32 %s863_s27, %s1077_s29 }
   0xc   : > { %p56_p5 = scmp.eq.s32.totalorder %s653_s3, 0  ;;  %p40_p6 = scmp.eq.s32.totalorder %s38_s8, 0 }
   0xd   : > { %p703_p8 = scmp.lt.s32.totalorder %s867_s28, 2  ;;  %s225_s11 = sand.u32 1, %s855_s25  }
   0xe   : > { %p960_p7 = por %p56_p5, %p55_p4  ;;  %s657_s12 = sshll.u32 %s863_s27, 7 }
   0xf   : > { %s966_s10 = scalar_select %p40_p6, %s855_s25, %s42_s30  }
  0x10   : > { %s656_s13 = sshll.u32 %s225_s11, 6  ;;  %s237_s16 = scalar_lea.hbm %s1060_s0, %s657_s12 }
  0x11   : > { %s229_s17 = scalar_lea.vmem [#allocation4], %s656_s13  ;;  %p975_p9 = pnand %p703_p8, %p951_p3 }
  0x12   : > { %s238_s18 = sshll.u32 %s229_s17, 4  ;;  %p658_p10 = scmp.ge.s32.totalorder %s867_s28, 1  ;;  %s239_s18 = int_to_ptr.vmem [resolvable:$true] %s238_s18 }
  0x13   : > { %s226_s20 = scalar_lea.sflag [#allocation5], %s225_s11  ;;  %p763_p11 = pneg %p975_p9 }
  0x14   : > { %s774_s21 = scalar_lea.vmem %s239_s18, 1024  ;;  %s869_s22 = smov [#allocation4]  }
  0x15   : > { %p775_p12 = scmp.ne.s32.totalorder %s239_s18, %s774_s21  ;;  %s779_s23 = sshll.u32 %s869_s22, 4  ;;  %s780_s23 = int_to_ptr.vmem [resolvable:$false] %s779_s23 }
  0x16   : > { %s781_s30 = scalar_lea.vmem %s780_s23, 2048  ;;  %p782_p1 = scmp.lt.s32.totalorder %s239_s18, %s780_s23 }
  0x17   : > { %p777_p13 = pnand %p775_p12, %p763_p11  ;;  %p783_p2 = scmp.lt.s32.totalorder %s781_s30, %s774_s21 }
  0x19   : > { %p778_p0 = pneg %p777_p13  ;;  %p784_p3 = por %p783_p2, %p782_p1 }
  0x1b   : > { %p785_p4 = pnand %p784_p3, %p778_p0 }
  0x1d   : > { %788 = shalt.err (!%p785_p4)
}
  0x1e   : > { %s870_s7 = smov 256   ;;  %s871_s8 = smov 128  }
  0x1f   : > { %s872_s11 = smov 8   ;;  %p246_p5 = scmp.lt.s32.totalorder %s867_s28, 3 }
  0x20   : > { %702 = dma.hbm_to_vmem [thread:$0]  (!%p975_p9), %s237_s16, 1024, %s239_s18, %s226_s20, %s870_s7, %s871_s8, %s872_s11  }
  0x21   : > { %p247_p6 = pnand %p658_p10, %p246_p5 }
  0x22   : > { %s252_s12 = sand.u32 (!%p247_p6), 1, %s851_s24  }
  0x23   : > { %250 = sbr.rel (%p247_p6) target bundleno = 632 (0x278), region = 44  ;;  %s659_s13 = sshll.u32 (!%p247_p6), %s252_s12, 6 }
  0x24   : > { %s253_s14 = scalar_lea.sflag (!%p247_p6), [#allocation5], %s252_s12  ;;  %s988_s15 = scalar_lea.vmem (!%p247_p6), [#allocation4], %s659_s13 }
  0x28   : > { %838 = dma.done.wait (%p960_p7), %s253_s14, 1024  }
  0x29   : > { %840 = vsyncadd (%p960_p7), %s253_s14, 4294966272  ;;  %p660_p8 = scmp.ne.s32.totalorder %s859_s26, 0 }
  0x2b   : > { %284 = sbr.rel (%p660_p8) target bundleno = 53 (0x35), region = 52 }
  0x30   : > { %v873_v0 = vmov 0.0  }
  0x31   : > { %285 = vst [vmem:[#allocation2 + $0x30] sm:$0xff] %v873_v0  ;;  %286 = vst [vmem:[#allocation2] sm:$0xff] %v873_v0 }
  0x32   : > { %287 = vst [vmem:[#allocation2 + $0x18] sm:$0xff] %v873_v0  ;;  %288 = vst [vmem:[#allocation2 + $0x10] sm:$0xff] %v873_v0 }
  0x33   : > { %289 = vst [vmem:[#allocation2 + $0x8] sm:$0xff] %v873_v0  ;;  %290 = vst [vmem:[#allocation2 + $0x20] sm:$0xff] %v873_v0 }
  0x34   : > { %291 = vst [vmem:[#allocation2 + $0x28] sm:$0xff] %v873_v0  ;;  %292 = vst [vmem:[#allocation2 + $0x38] sm:$0xff] %v873_v0 }
  0x35 PF: > { %v293_v1 = vld [vmem:[%s988_s15] sm:$0xff]  ;;  %v294_v3 = vld [vmem:[%s988_s15 + $0x8] sm:$0xff]  ;;  %v295_v6 = vld [vmem:[%s988_s15 + $0x10] sm:$0xff]  ;;  %p661_p7 = scmp.ne.s32.totalorder %s859_s26, 1 }
  0x36   : > { %v296_v10 = vld [vmem:[%s988_s15 + $0x18] sm:$0xff]  ;;  %v297_v12 = vld [vmem:[%s988_s15 + $0x20] sm:$0xff]  ;;  %v298_v15 = vld [vmem:[%s988_s15 + $0x28] sm:$0xff]  ;;  %s493_s30 = sld [smem:[#allocation3]] (!%p661_p7) }
  0x37   : > { %v299_v19 = vld [vmem:[%s988_s15 + $0x30] sm:$0xff]  ;;  %v300_v21 = vld [vmem:[%s988_s15 + $0x38] sm:$0xff] }
  0x38   : > { %v301_v2 = vld [vmem:[#allocation2 + $0x30] sm:$0xff]  ;;  %v302_v5 = vld [vmem:[#allocation2] sm:$0xff] }
  0x39   : > { %v309_v4 = vadd.f32 %v301_v2, %v293_v1  ;;  %v303_v7 = vld [vmem:[#allocation2 + $0x18] sm:$0xff]  ;;  %v310_v8 = vadd.f32 %v302_v5, %v294_v3  ;;  %v304_v11 = vld [vmem:[#allocation2 + $0x10] sm:$0xff] }
  0x3a   : > { %v311_v9 = vadd.f32 %v303_v7, %v295_v6  ;;  %v312_v13 = vadd.f32 %v304_v11, %v296_v10  ;;  %v305_v14 = vld [vmem:[#allocation2 + $0x8] sm:$0xff]  ;;  %v306_v16 = vld [vmem:[#allocation2 + $0x20] sm:$0xff]  ;;  %328 = sbr.rel (%p661_p7) target bundleno = 617 (0x269), region = 56 }
  0x3b   : > { %317 = vst [vmem:[#allocation2 + $0x30] sm:$0xff] %v309_v4  ;;  %318 = vst [vmem:[#allocation2] sm:$0xff] %v310_v8  ;;  %v313_v17 = vadd.f32 %v305_v14, %v297_v12  ;;  %v314_v18 = vadd.f32 %v306_v16, %v298_v15  ;;  %v307_v20 = vld [vmem:[#allocation2 + $0x28] sm:$0xff]  ;;  %v308_v23 = vld [vmem:[#allocation2 + $0x38] sm:$0xff] }
  0x3c   : > { %319 = vst [vmem:[#allocation2 + $0x18] sm:$0xff] %v311_v9  ;;  %320 = vst [vmem:[#allocation2 + $0x10] sm:$0xff] %v312_v13  ;;  %v315_v22 = vadd.f32 %v307_v20, %v299_v19  ;;  %v316_v24 = vadd.f32 %v308_v23, %v300_v21 }
  0x3d   : > { %321 = vst [vmem:[#allocation2 + $0x8] sm:$0xff] %v313_v17  ;;  %322 = vst [vmem:[#allocation2 + $0x20] sm:$0xff] %v314_v18 }
  0x3e   : > { %323 = vst [vmem:[#allocation2 + $0x28] sm:$0xff] %v315_v22  ;;  %324 = vst [vmem:[#allocation2 + $0x38] sm:$0xff] %v316_v24 }
  0x3f   : > { %v874_v33 = vmov 0.0   ;;  %v356_v34 = vld [vmem:[%s1061_s1 + $0x18] sm:$0xff]  ;;  %v355_v35 = vld [vmem:[%s1061_s1 + $0x10] sm:$0xff]  ;;  %v354_v36 = vld [vmem:[%s1061_s1 + $0x8] sm:$0xff]  ;;  %vm875_vm0 = vmmov 0   ;;  %v372_v38 = vlaneseq  ;;  %vm383_vm1 = vcmask 130112  }
  0x40   : > { %677 = vmatprep.subr.mxu0 %v874_v33  ;;  %688 = vmatprep.subr.mxu1 %v874_v33  ;;  %v353_v37 = vld [vmem:[%s1061_s1] sm:$0xff]  ;;  %vm390_vm2 = vcmask 195712   ;;  %vm397_vm3 = vcmask 261312   ;;  %vm418_vm4 = vcmask 1041409   ;;  %vm420_vm5 = vcmask 261120  }
  0x41   : > { %678 = vmatpush3.msra.mxu0 %v356_v34  ;;  %685 = vmatprep.mubr.msk.f32.mxu0 %vm875_vm0, %v874_v33  ;;  %v373_v39 = vand.u32 127, %v372_v38  ;;  %v375_v44 = vshrl.u32 %v372_v38, 7  ;;  %v498_v7 = vld [vmem:[%s1064_s4] sm:$0xff]  ;;  %v495_v10 = vstv %s493_s30  ;;  %vm506_vm7 = vcmask 64512  }
  0x42   : > { %v329_v26 = vld [vmem:[#allocation2 + $0x30] sm:$0xff]  ;;  %v330_v28 = vld [vmem:[#allocation2] sm:$0xff]  ;;  %679 = vmatprep.subr.mxu0 %v874_v33  ;;  %690 = vmatprep.mubr.msk.f32.mxu1 %vm875_vm0, %v874_v33 }
  0x43   : > { %337 = vadd.xlane.f32.xlu0 %v329_v26  ;;  %v331_v30 = vld [vmem:[#allocation2 + $0x18] sm:$0xff]  ;;  %v332_v32 = vld [vmem:[#allocation2 + $0x10] sm:$0xff]  ;;  %680 = vmatpush3.msra.mxu0 %v355_v35  ;;  %v378_v42 = vadd.s32 4294967288, %v373_v39  ;;  %v385_v43 = vadd.s32 4294967280, %v373_v39  ;;  %v392_v48 = vadd.s32 4294967272, %v373_v39  ;;  %v376_v50 = vsub.s32 %v373_v39, %v375_v44 }
  0x44   : > { %v333_v25 = vld [vmem:[#allocation2 + $0x8] sm:$0xff]  ;;  %v334_v27 = vld [vmem:[#allocation2 + $0x20] sm:$0xff]  ;;  %681 = vmatprep.subr.mxu0 %v874_v33  ;;  %689 = vmatpush3.msra.mxu1 %v498_v7 }
  0x45   : > { %345 = vadd.xlane.f32.xlu1 %v333_v25  ;;  %v335_v29 = vld [vmem:[#allocation2 + $0x28] sm:$0xff]  ;;  %v336_v31 = vld [vmem:[#allocation2 + $0x38] sm:$0xff]  ;;  %682 = vmatpush3.msra.mxu0 %v354_v36  ;;  %v381_v47 = vsub.s32 %v378_v42, %v375_v44  ;;  %v388_v49 = vsub.s32 %v385_v43, %v375_v44  ;;  %v395_v55 = vsub.s32 %v392_v48, %v375_v44  ;;  %v662_v8 = vld [vmem:[%s1062_s2] ss:$0 sm:$0xff] }
  0x46   : > { %683 = vmatprep.subr.mxu0 %v874_v33  ;;  %v664_v15 = vld [vmem:[%s1065_s5] ss:$0 sm:$0xff] }
  0x47   : > { %339 = vadd.xlane.f32.xlu0 %v330_v28  ;;  %684 = vmatpush3.msra.mxu0 %v353_v37 }
  0x49   : > { %347 = vadd.xlane.f32.xlu1 %v334_v27 }
  0x4b   : > { %341 = vadd.xlane.f32.xlu0 %v331_v30 }
  0x4d   : > { %349 = vadd.xlane.f32.xlu1 %v335_v29 }
  0x4f   : > { %343 = vadd.xlane.f32.xlu0 %v332_v32 }
  0x51   : > { %351 = vadd.xlane.f32.xlu1 %v336_v31 }
  0xcc   : > { %v338_v41 = vpop.xlane.xlu0 %337 }
  0xcd   : > { %v377_v59 = vrot.slane %v338_v41, %v376_v50 }
  0xce   : > { %v346_v40 = vpop.xlane.xlu1 %345 }
  0xcf   : > { %v402_v58 = vrot.slane %v346_v40, %v376_v50 }
  0xd0   : > { %v340_v46 = vpop.xlane.xlu0 %339 }
  0xd1   : > { %v382_v54 = vrot.slane %v340_v46, %v381_v47 }
  0xd2   : > { %v348_v45 = vpop.xlane.xlu1 %347 }
  0xd3   : > { %v406_v53 = vrot.slane %v348_v45, %v381_v47  ;;  %v384_v63 = vsel %vm383_vm1, %v382_v54, %v377_v59 }
  0xd4   : > { %v342_v52 = vpop.xlane.xlu0 %341 }
  0xd5   : > { %v389_v57 = vrot.slane %v342_v52, %v388_v49  ;;  %v407_v62 = vsel %vm383_vm1, %v406_v53, %v402_v58 }
  0xd6   : > { %v350_v51 = vpop.xlane.xlu1 %349 }
  0xd7   : > { %v411_v56 = vrot.slane %v350_v51, %v388_v49  ;;  %v391_v3 = vsel %vm390_vm2, %v389_v57, %v384_v63 }
  0xd8   : > { %v344_v61 = vpop.xlane.xlu0 %343 }
  0xd9   : > { %v396_v1 = vrot.slane %v344_v61, %v395_v55  ;;  %v412_v2 = vsel %vm390_vm2, %v411_v56, %v407_v62 }
  0xda   : > { %v352_v60 = vpop.xlane.xlu1 %351 }
  0xdb   : > { %v416_v0 = vrot.slane %v352_v60, %v395_v55  ;;  %v398_v5 = vsel %vm397_vm3, %v396_v1, %v391_v3 }
  0xdd   : > { %v417_v4 = vsel %vm397_vm3, %v416_v0, %v412_v2 }
  0xde   : > { %v419_v6 = vsel %vm418_vm4, %v417_v4, %v398_v5 }
  0xdf   : > { %686 = vmatmul.mubr.msk.f32.vlgmr.msra.gmra.mxu0 %vm420_vm5, %v419_v6 }
 0x19f   : > { %v489_v9 = vpop.f32.mrf.mxu0 }
 0x1a0   : > { %v490_v11 = vadd.f32 %v662_v8, %v489_v9 }
 0x1a1   : > { %v687_v12 = vpop.f32.mrf.mxu0 }
 0x1a2   : > { %vm494_vm6 = vcmp.gt.f32.partialorder %v490_v11, 0.0  ;;  %v496_v13 = vmul.f32 %v495_v10, %v490_v11 }
 0x1a4   : > { %v497_v14 = vsel %vm494_vm6, %v490_v11, %v496_v13 }
 0x1a5   : > { %691 = vmatmul.mubr.msk.f32.vlgmr.msra.gmra.mxu1 %vm506_vm7, %v497_v14 }
 0x265   : > { %v576_v16 = vpop.f32.mrf.mxu1 }
 0x266   : > { %v577_v17 = vadd.f32 %v664_v15, %v576_v16 }
 0x267   : > { %v692_v18 = vpop.f32.mrf.mxu1 }
 0x268   : > { %580 = vst [vmem:[#allocation7] sm:$0x3] %v577_v17 }
 0x269 PF: > { %p1027_p9 = scmp.eq.s32.totalorder %s653_s3, 1  ;;  %s876_s14 = smov [#allocation7]  }
 0x26a   : > { %s590_s15 = sshll.u32 %s876_s14, 4  ;;  %s591_s15 = int_to_ptr.vmem [resolvable:$true] %s590_s15 }
 0x26b   : > { %s789_s26 = scalar_lea.vmem %s591_s15, 32  ;;  %p796_p13 = scmp.lt.s32.totalorder %s591_s15, %s591_s15 }
 0x26c   : > { %p790_p10 = scmp.ne.s32.totalorder %s591_s15, %s789_s26  ;;  %p797_p0 = scmp.lt.s32.totalorder %s789_s26, %s789_s26 }
 0x26e   : > { %p791_p11 = pnand %p790_p10, %p1027_p9  ;;  %p798_p1 = por %p797_p0, %p796_p13 }
 0x270   : > { %p792_p12 = pneg %p791_p11 }
 0x272   : > { %p799_p2 = pnand %p798_p1, %p792_p12 }
 0x274   : > { %802 = shalt.err (!%p799_p2)
}
 0x275   : > { %696 = dma.vmem_to_hbm [thread:$0]  (%p1027_p9), %s591_s15, 32, %s1066_s6, [#allocation6]  }
 0x276   : > { %842 = dma.done.wait (%p1027_p9), [#allocation6], 32  }
 0x277   : > { %844 = vsyncadd (%p1027_p9), [#allocation6], 4294967264 }
 0x278 PF: > { %s21_s28 = sadd.s32 1, %s867_s28   ;;  %s1071_s23 = smov %s851_s24 }
 0x279   : > { %p18_p3 = scmp.ge.s32.totalorder %s21_s28, 4   ;;  %s1072_s24 = smov %s855_s25 }
 0x27a   : > { %s1073_s25 = smov %s966_s10  ;;  %s1074_s26 = smov %s863_s27 }
 0x27b   : > { %s1075_s27 = smov %s1077_s29  ;;  %20 = sbr.rel (!%p18_p3) target bundleno = 7 (0x7), region = 90 }
 0x280   :  { %603 = vsyncpa [#allocation5], 1 }
 0x281   :  { %605 = vsyncpa [#allocation5 + $0x1], 1 }
 0x282   :  { %606 = vsyncpa [#allocation6], 1 }
 0x283   :  { %608 = vsyncpa [#allocation6 + $0x1], 1 }

</bundles_post_ra>
